<compile_context>
chip_gen: v7x
topology: tpu7x:2x2x1
jax: 0.10.0
libtpu: 0.0.40
codegen_flags: <defaults>
</compile_context>

<pallas_src>
import functools

import jax
import jax.numpy as jnp
from jax.experimental import pallas as pl
from jax.experimental.pallas import tpu as pltpu

_LN_EPS = 1e-5


def _largest_aligned_divisor(n, align, cap):
    """Largest divisor of n that is a multiple of `align` and <= cap (requires align | n)."""
    best = align
    t = align
    while t <= min(n, cap):
        if n % t == 0:
            best = t
        t += align
    return best


def _ln_layout(S, D, max_lane=4096, target_block_bytes=2 << 20):
    """Flatten (S, D) -> (R, L) with L = g*D lane-dense, and pick a row-tile tR."""
    g = 1
    for cand in range(1, S + 1):
        if S % cand == 0 and cand * D <= max_lane:
            g = cand
    L = g * D
    R = S // g
    if R % 8 == 0:
        cap_rows = max(8, min(R, target_block_bytes // (L * 4)))
        tR = _largest_aligned_divisor(R, 8, cap_rows)
    else:
        tR = R  # full-extent block (allowed when it equals the array dim)
    return L, R, tR


# ----------------------------------------------------------------------------
# Kernel 1: z = x + (relu(x @ w1 + b1) @ w2 + b2), streamed over the hidden dim F,
# plus per-(b, s-tile) partial layer-norm column statistics (sum, sum of squares).
# Grid: (B, S//tS, F//tF)  — F innermost, "arbitrary" (reduction into f32 VMEM acc).
# Weights are VMEM-resident (constant index_map); the F-tile is chosen in-kernel.
# ----------------------------------------------------------------------------
def _ffn_residual_kernel(x_ref, w1_ref, b1_ref, w2_ref, b2_ref,
                         z_ref, stats_ref, acc_ref, *, resident):
    f = pl.program_id(2)
    nf = pl.num_programs(2)

    x = x_ref[0]                                    # (tS, D) f32

    @pl.when(f == 0)
    def _init():
        # f32 residual + output bias folded into the accumulator.
        acc_ref[...] = x + b2_ref[...]

    idx = f if resident else 0
    w1t = w1_ref[idx]                               # (D, tF)  bf16
    b1t = b1_ref[idx]                               # (1, tF)  f32
    w2t = w2_ref[idx]                               # (tF, D)  bf16

    # linear1 tile + bias + ReLU (bf16 operands, f32 MXU accumulation, f32 elementwise).
    h = jnp.dot(x.astype(jnp.bfloat16), w1t, preferred_element_type=jnp.float32)
    h = jnp.maximum(h + b1t, 0.0)                   # (tS, tF) f32

    # linear2 partial product accumulated into the f32 scratch.
    acc_ref[...] += jnp.dot(h.astype(jnp.bfloat16), w2t,
                            preferred_element_type=jnp.float32)

    @pl.when(f == nf - 1)
    def _finalize():
        z = acc_ref[...]                            # (tS, D) f32
        z_ref[0] = z.astype(jnp.bfloat16)
        # Per-column partial sums; final scalar reduction happens in (tiny) JAX code.
        stats_ref[0, 0, 0:1, :] = jnp.sum(z, axis=0, keepdims=True)
        stats_ref[0, 0, 1:2, :] = jnp.sum(z * z, axis=0, keepdims=True)


# ----------------------------------------------------------------------------
# Kernel 2: out = z * scale[b] + shift[b]   (scale = rstd, shift = -mean * rstd)
# Operates on flat lane-dense blocks of z; per-batch scalars scalar-prefetched to SMEM.
# ----------------------------------------------------------------------------
def _layer_norm_kernel(scale_ref, shift_ref, z_ref, o_ref):
    b = pl.program_id(0)
    o_ref[0] = z_ref[0].astype(jnp.float32) * scale_ref[b] + shift_ref[b]


@functools.partial(jax.jit, static_argnames=("block_s", "block_f", "vmem_cap_bytes"))
def position_wise_feed_forward(x, w1, b1, w2, b2, *,
                               block_s=512, block_f=512,
                               vmem_cap_bytes=48 * 1024 * 1024):
    """x: [B, S, D], w1: [D, F], b1: [F], w2: [F, D], b2: [D] -> [B, S, D] (float32)."""
    B, S, D = x.shape
    F = w1.shape[1]
    if (D % 128) or (F % 128) or (S % 8):
        raise ValueError(
            f"d_model/d_ffn must be multiples of 128 and seq a multiple of 8 "
            f"(pad upstream); got S={S}, D={D}, F={F}")

    tS = _largest_aligned_divisor(S, 8, block_s)       # sublane-aligned S tile
    tF = _largest_aligned_divisor(F, 128, block_f)     # lane-aligned hidden tile (keep <=512)
    nS, nF = S // tS, F // tF

    # Operand preparation: f32 x (for the residual / stats), bf16 weights reshaped so
    # the F-tile index is a leading dimension (one-time, negligible HBM cost).
    x32 = x.astype(jnp.float32)
    w1_t = w1.astype(jnp.bfloat16).reshape(D, nF, tF).transpose(1, 0, 2)   # (nF, D, tF)
    w2_t = w2.astype(jnp.bfloat16).reshape(nF, tF, D)                      # (nF, tF, D)
    b1_t = b1.astype(jnp.float32).reshape(nF, 1, tF)                       # (nF, 1, tF)
    b2_2d = b2.reshape(1, D).astype(jnp.float32)                           # (1, D)

    # ---- VMEM budget: resident weights if they fit (conservatively assume the pipeline
    # double-buffers even constant blocks) together with the activation tiles.
    def vmem_bytes(resident):
        if resident:
            w = 2 * (D * F * 2 + F * D * 2 + F * 4 + D * 4)
        else:
            w = 2 * (D * tF * 2 + tF * D * 2 + tF * 4 + D * 4)
        act = 2 * (tS * D * 4)        # x (f32) in, double buffered
        act += 2 * (tS * D * 2)       # z (bf16) out, double buffered
        act += 2 * (8 * D * 4)        # stats out
        act += tS * D * 4             # f32 accumulator scratch
        act += 2 * (tS * tF * 4)      # hidden temp + slack
        return w + act

    resident = vmem_bytes(True) + (4 << 20) <= vmem_cap_bytes
    vmem_limit = int(min(vmem_cap_bytes, max(32 << 20, vmem_bytes(resident) + (4 << 20))))

    if resident:
        # Constant index_map -> DMA'd once, kept resident across the whole grid.
        w1_spec = pl.BlockSpec((nF, D, tF), lambda b, s, f: (0, 0, 0))
        b1_spec = pl.BlockSpec((nF, 1, tF), lambda b, s, f: (0, 0, 0))
        w2_spec = pl.BlockSpec((nF, tF, D), lambda b, s, f: (0, 0, 0))
        weight_read_bytes = D * F * 2 + F * D * 2 + F * 4
    else:
        # Fallback: stream one F-tile per grid step (re-fetched per (b, s)).
        w1_spec = pl.BlockSpec((1, D, tF), lambda b, s, f: (f, 0, 0))
        b1_spec = pl.BlockSpec((1, 1, tF), lambda b, s, f: (f, 0, 0))
        w2_spec = pl.BlockSpec((1, tF, D), lambda b, s, f: (f, 0, 0))
        weight_read_bytes = B * nS * (D * F * 2 + F * D * 2 + F * 4)

    flops = 4 * B * S * D * F                           # two matmuls, 2 flops / MAC
    bytes_accessed = (B * S * D * 4                     # x read (f32)
                      + weight_read_bytes + D * 4       # weights / biases
                      + B * S * D * 2                   # z write (bf16)
                      + B * nS * 8 * D * 4)             # LN partial stats write

    kernel = functools.partial(_ffn_residual_kernel, resident=resident)

    z, stats = pl.pallas_call(
        kernel,
        out_shape=(
            jax.ShapeDtypeStruct((B, S, D), jnp.bfloat16),          # z = x + FFN(x)
            jax.ShapeDtypeStruct((B, nS, 8, D), jnp.float32),       # partial LN column stats
        ),
        grid_spec=pltpu.PrefetchScalarGridSpec(
            num_scalar_prefetch=0,
            grid=(B, nS, nF),
            in_specs=[
                pl.BlockSpec((1, tS, D), lambda b, s, f: (b, s, 0)),   # x tile (f32)
                w1_spec,
                b1_spec,
                w2_spec,
                pl.BlockSpec((1, D), lambda b, s, f: (0, 0)),          # b2 (resident)
            ],
            out_specs=(
                pl.BlockSpec((1, tS, D), lambda b, s, f: (b, s, 0)),
                pl.BlockSpec((1, 1, 8, D), lambda b, s, f: (b, s, 0, 0)),
            ),
            scratch_shapes=[pltpu.VMEM((tS, D), jnp.float32)],          # f32 accumulator
        ),
        compiler_params=pltpu.CompilerParams(
            dimension_semantics=("parallel", "parallel", "arbitrary"),
            vmem_limit_bytes=vmem_limit,
        ),
        cost_estimate=pl.CostEstimate(
            flops=flops, transcendentals=0, bytes_accessed=bytes_accessed),
    )(x32, w1_t, b1_t, w2_t, b2_2d)

    # Tiny per-batch reduction of the partial statistics (f32).
    n_elems = jnp.float32(S * D)
    zsum = jnp.sum(stats[:, :, 0, :], axis=(1, 2))       # (B,)
    zsq = jnp.sum(stats[:, :, 1, :], axis=(1, 2))        # (B,)
    mean = zsum / n_elems
    var = jnp.maximum(zsq / n_elems - mean * mean, 0.0)
    rstd = jax.lax.rsqrt(var + _LN_EPS)
    scale = rstd                                          # (B,) f32
    shift = -mean * rstd                                  # (B,) f32

    # LN apply over flat, lane-dense blocks (decoupled from kernel-1's tiling).
    L, R, tR = _ln_layout(S, D)
    z_flat = z.reshape(B, R, L)                           # contiguity-preserving (free)

    out = pl.pallas_call(
        _layer_norm_kernel,
        out_shape=jax.ShapeDtypeStruct((B, R, L), jnp.float32),
        grid_spec=pltpu.PrefetchScalarGridSpec(
            num_scalar_prefetch=2,                        # scale, shift -> SMEM
            grid=(B, R // tR),
            in_specs=[
                pl.BlockSpec((1, tR, L), lambda b, r, sc, sh: (b, r, 0)),
            ],
            out_specs=pl.BlockSpec((1, tR, L), lambda b, r, sc, sh: (b, r, 0)),
        ),
        compiler_params=pltpu.CompilerParams(
            dimension_semantics=("parallel", "parallel"),
            vmem_limit_bytes=32 * 1024 * 1024,
        ),
    )(scale, shift, z_flat)

    return out.reshape(B, S, D)


def _reference(x, w1, b1, w2, b2):
    # Matches the kernel's numerics: bf16 MXU operands with f32 accumulation, f32
    # residual / bias / LN statistics, z rounded to bf16 before the LN apply.
    xb = x.astype(jnp.bfloat16).astype(jnp.float32)
    w1b = w1.astype(jnp.bfloat16).astype(jnp.float32)
    w2b = w2.astype(jnp.bfloat16).astype(jnp.float32)
    h = jnp.maximum(xb @ w1b + b1, 0.0)
    hb = h.astype(jnp.bfloat16).astype(jnp.float32)
    z = x + (hb @ w2b + b2)
    mean = jnp.mean(z, axis=(1, 2), keepdims=True)
    var = jnp.mean((z - mean) ** 2, axis=(1, 2), keepdims=True)
    zq = z.astype(jnp.bfloat16).astype(jnp.float32)       # kernel stores z in bf16
    return (zq - mean) * jax.lax.rsqrt(var + _LN_EPS)


if __name__ == "__main__":
    # Small but lane/sublane-aligned shapes; tile sizes chosen so the grid has multiple
    # S tiles and multiple F (reduction) tiles: grid = (2, 2, 2); weights are resident.
    B, S, d_model, d_ffn = 2, 256, 128, 512

    key = jax.random.PRNGKey(0)
    kx, k1, k2, k3, k4 = jax.random.split(key, 5)

    x = jax.random.normal(kx, (B, S, d_model), dtype=jnp.float32)
    w1 = jax.random.normal(k1, (d_model, d_ffn), dtype=jnp.float32) * (1.0 / jnp.sqrt(d_model))
    b1 = jax.random.normal(k2, (d_ffn,), dtype=jnp.float32) * 0.01
    w2 = jax.random.normal(k3, (d_ffn, d_model), dtype=jnp.float32) * (1.0 / jnp.sqrt(d_ffn))
    b2 = jax.random.normal(k4, (d_model,), dtype=jnp.float32) * 0.01

    out = position_wise_feed_forward(x, w1, b1, w2, b2, block_s=128, block_f=256)
    out = jax.block_until_ready(out)

    ref = _reference(x, w1, b1, w2, b2)
    assert out.shape == (B, S, d_model)
    max_err = float(jnp.max(jnp.abs(out - ref)))
    # Tolerance covers one bf16 ulp of the stored z (z is written back in bfloat16),
    # which is up to ~4e-3 relative on the LayerNorm input.
    assert jnp.allclose(out, ref, atol=5e-3, rtol=5e-3), \
        f"mismatch vs reference (max abs err {max_err})"

    print("KERNEL_OK")
</pallas_src>

<mosaic_0001>
module attributes {stable_mosaic.version = 11 : i64} {
  func.func @_ffn_residual_kernel(%arg0: i32, %arg1: i32, %arg2: i32, %arg3: memref<1x128x128xf32, #tpu.memory_space<vmem>>, %arg4: memref<2x128x256xbf16, #tpu.memory_space<vmem>>, %arg5: memref<2x1x256xf32, #tpu.memory_space<vmem>>, %arg6: memref<2x256x128xbf16, #tpu.memory_space<vmem>>, %arg7: memref<1x128xf32, #tpu.memory_space<vmem>>, %arg8: memref<1x128x128xbf16, #tpu.memory_space<vmem>>, %arg9: memref<1x1x8x128xf32, #tpu.memory_space<vmem>>, %arg10: memref<128x128xf32, #tpu.memory_space<vmem>>) attributes {dimension_semantics = [#tpu.dimension_semantics<parallel>, #tpu.dimension_semantics<parallel>, #tpu.dimension_semantics<arbitrary>], iteration_bounds = array<i64: 2, 2, 2>, scalar_prefetch = 0 : i64, scratch_operands = 1 : i64, tpu.core_type = #tpu.core_type<tc>, window_params = [{transform_indices = @transform_0, window_bounds = array<i64: 1, 128, 128>}, {pipeline_mode = #tpu.pipeline_mode<synchronous>, transform_indices = @transform_1, window_bounds = array<i64: 2, 128, 256>}, {pipeline_mode = #tpu.pipeline_mode<synchronous>, transform_indices = @transform_2, window_bounds = array<i64: 2, 1, 256>}, {pipeline_mode = #tpu.pipeline_mode<synchronous>, transform_indices = @transform_3, window_bounds = array<i64: 2, 256, 128>}, {pipeline_mode = #tpu.pipeline_mode<synchronous>, transform_indices = @transform_4, window_bounds = array<i64: 1, 128>}, {transform_indices = @transform_5, window_bounds = array<i64: 1, 128, 128>}, {transform_indices = @transform_6, window_bounds = array<i64: 1, 1, 8, 128>}]} {
    %c0 = arith.constant 0 : index
    %c0_0 = arith.constant 0 : index
    %c0_1 = arith.constant 0 : index
    %0 = vector.load %arg3[%c0, %c0_0, %c0_1] : memref<1x128x128xf32, #tpu.memory_space<vmem>>, vector<1x128x128xf32>
    %1 = vector.shape_cast %0 : vector<1x128x128xf32> to vector<128x128xf32>
    %c0_i32 = arith.constant 0 : i32
    %2 = arith.cmpi eq, %arg2, %c0_i32 : i32
    %3 = arith.extui %2 : i1 to i32
    %c0_i32_2 = arith.constant 0 : i32
    %4 = arith.cmpi ne, %3, %c0_i32_2 : i32
    scf.if %4 {
      %c0_16 = arith.constant 0 : index
      %c0_17 = arith.constant 0 : index
      %28 = vector.load %arg7[%c0_16, %c0_17] : memref<1x128xf32, #tpu.memory_space<vmem>>, vector<1x128xf32>
      %29 = vector.broadcast %28 : vector<1x128xf32> to vector<128x128xf32>
      %30 = arith.addf %1, %29 : vector<128x128xf32>
      %c0_18 = arith.constant 0 : index
      %c0_19 = arith.constant 0 : index
      %31 = vector.load %arg10[%c0_18, %c0_19] : memref<128x128xf32, #tpu.memory_space<vmem>>, vector<128x128xf32>
      tpu.vector_store %arg10[%c0_18, %c0_19], %30 {strides = array<i32>} : memref<128x128xf32, #tpu.memory_space<vmem>>, vector<128x128xf32>,
    } else {
    }
    %5 = arith.index_cast %arg2 : i32 to index
    %c0_3 = arith.constant 0 : index
    %c0_4 = arith.constant 0 : index
    %6 = vector.load %arg4[%5, %c0_3, %c0_4] : memref<2x128x256xbf16, #tpu.memory_space<vmem>>, vector<1x128x256xbf16>
    %7 = vector.shape_cast %6 : vector<1x128x256xbf16> to vector<128x256xbf16>
    %8 = arith.index_cast %arg2 : i32 to index
    %c0_5 = arith.constant 0 : index
    %c0_6 = arith.constant 0 : index
    %9 = vector.load %arg5[%8, %c0_5, %c0_6] : memref<2x1x256xf32, #tpu.memory_space<vmem>>, vector<1x1x256xf32>
    %10 = vector.shape_cast %9 : vector<1x1x256xf32> to vector<1x256xf32>
    %11 = arith.index_cast %arg2 : i32 to index
    %c0_7 = arith.constant 0 : index
    %c0_8 = arith.constant 0 : index
    %12 = vector.load %arg6[%11, %c0_7, %c0_8] : memref<2x256x128xbf16, #tpu.memory_space<vmem>>, vector<1x256x128xbf16>
    %13 = vector.shape_cast %12 : vector<1x256x128xbf16> to vector<256x128xbf16>
    %14 = arith.truncf %1 : vector<128x128xf32> to vector<128x128xbf16>
    %cst = arith.constant dense<0.000000e+00> : vector<128x256xf32>
    %15 = tpu.matmul %14, %7, %cst {dimension_numbers = #tpu.dot_dimension_numbers<[1], [0], [0], [1], [0, 0, 1, 1], [], []>} : vector<128x128xbf16>, vector<128x256xbf16>, vector<128x256xf32> -> vector<128x256xf32>
    %16 = vector.broadcast %10 : vector<1x256xf32> to vector<128x256xf32>
    %17 = arith.addf %15, %16 : vector<128x256xf32>
    %cst_9 = arith.constant 0.000000e+00 : f32
    %18 = vector.broadcast %cst_9 : f32 to vector<128x256xf32>
    %19 = arith.maximumf %17, %18 : vector<128x256xf32>
    %c0_10 = arith.constant 0 : index
    %c0_11 = arith.constant 0 : index
    %20 = vector.load %arg10[%c0_10, %c0_11] : memref<128x128xf32, #tpu.memory_space<vmem>>, vector<128x128xf32>
    %21 = arith.truncf %19 : vector<128x256xf32> to vector<128x256xbf16>
    %cst_12 = arith.constant dense<0.000000e+00> : vector<128x128xf32>
    %22 = tpu.matmul %21, %13, %cst_12 {dimension_numbers = #tpu.dot_dimension_numbers<[1], [0], [0], [1], [0, 0, 1, 1], [], []>} : vector<128x256xbf16>, vector<256x128xbf16>, vector<128x128xf32> -> vector<128x128xf32>
    %23 = arith.addf %20, %22 : vector<128x128xf32>
    %c0_13 = arith.constant 0 : index
    %c0_14 = arith.constant 0 : index
    %24 = vector.load %arg10[%c0_13, %c0_14] : memref<128x128xf32, #tpu.memory_space<vmem>>, vector<128x128xf32>
    tpu.vector_store %arg10[%c0_13, %c0_14], %23 {strides = array<i32>} : memref<128x128xf32, #tpu.memory_space<vmem>>, vector<128x128xf32>,
    %c1_i32 = arith.constant 1 : i32
    %25 = arith.cmpi eq, %arg2, %c1_i32 : i32
    %26 = arith.extui %25 : i1 to i32
    %c0_i32_15 = arith.constant 0 : i32
    %27 = arith.cmpi ne, %26, %c0_i32_15 : i32
    scf.if %27 {
      %c0_16 = arith.constant 0 : index
      %c0_17 = arith.constant 0 : index
      %28 = vector.load %arg10[%c0_16, %c0_17] : memref<128x128xf32, #tpu.memory_space<vmem>>, vector<128x128xf32>
      %29 = arith.truncf %28 : vector<128x128xf32> to vector<128x128xbf16>
      %c0_18 = arith.constant 0 : index
      %c0_19 = arith.constant 0 : index
      %c0_20 = arith.constant 0 : index
      %30 = vector.load %arg8[%c0_18, %c0_19, %c0_20] : memref<1x128x128xbf16, #tpu.memory_space<vmem>>, vector<1x128x128xbf16>
      %31 = vector.shape_cast %30 : vector<1x128x128xbf16> to vector<128x128xbf16>
      %32 = vector.shape_cast %29 : vector<128x128xbf16> to vector<1x128x128xbf16>
      tpu.vector_store %arg8[%c0_18, %c0_19, %c0_20], %32 {strides = array<i32>} : memref<1x128x128xbf16, #tpu.memory_space<vmem>>, vector<1x128x128xbf16>,
      %cst_21 = arith.constant dense<0.000000e+00> : vector<128xf32>
      %33 = vector.multi_reduction <add>, %28, %cst_21 [0] : vector<128x128xf32> to vector<128xf32>
      %34 = vector.shape_cast %33 : vector<128xf32> to vector<1x128xf32>
      %c0_22 = arith.constant 0 : index
      %c0_23 = arith.constant 0 : index
      %c0_24 = arith.constant 0 : index
      %c0_25 = arith.constant 0 : index
      %35 = vector.load %arg9[%c0_22, %c0_23, %c0_24, %c0_25] : memref<1x1x8x128xf32, #tpu.memory_space<vmem>>, vector<1x1x1x128xf32>
      %36 = vector.shape_cast %35 : vector<1x1x1x128xf32> to vector<1x128xf32>
      %37 = vector.shape_cast %34 : vector<1x128xf32> to vector<1x1x1x128xf32>
      tpu.vector_store %arg9[%c0_22, %c0_23, %c0_24, %c0_25], %37 {strides = array<i32>} : memref<1x1x8x128xf32, #tpu.memory_space<vmem>>, vector<1x1x1x128xf32>,
      %38 = arith.mulf %28, %28 : vector<128x128xf32>
      %cst_26 = arith.constant dense<0.000000e+00> : vector<128xf32>
      %39 = vector.multi_reduction <add>, %38, %cst_26 [0] : vector<128x128xf32> to vector<128xf32>
      %40 = vector.shape_cast %39 : vector<128xf32> to vector<1x128xf32>
      %c0_27 = arith.constant 0 : index
      %c0_28 = arith.constant 0 : index
      %c1 = arith.constant 1 : index
      %c0_29 = arith.constant 0 : index
      %41 = vector.load %arg9[%c0_27, %c0_28, %c1, %c0_29] : memref<1x1x8x128xf32, #tpu.memory_space<vmem>>, vector<1x1x1x128xf32>
      %42 = vector.shape_cast %41 : vector<1x1x1x128xf32> to vector<1x128xf32>
      %43 = vector.shape_cast %40 : vector<1x128xf32> to vector<1x1x1x128xf32>
      tpu.vector_store %arg9[%c0_27, %c0_28, %c1, %c0_29], %43 {strides = array<i32>} : memref<1x1x8x128xf32, #tpu.memory_space<vmem>>, vector<1x1x1x128xf32>,
    } else {
    }
    return
  }
  func.func @transform_0(%arg0: i32, %arg1: i32, %arg2: i32) -> (i32, i32, i32) {
    %c0_i32 = arith.constant 0 : i32
    %c0_i32_0 = arith.constant 0 : i32
    return %arg0, %arg1, %c0_i32 : i32, i32, i32
  }
  func.func @transform_1(%arg0: i32, %arg1: i32, %arg2: i32) -> (i32, i32, i32) {
    %c0_i32 = arith.constant 0 : i32
    %c0_i32_0 = arith.constant 0 : i32
    %c0_i32_1 = arith.constant 0 : i32
    %c0_i32_2 = arith.constant 0 : i32
    return %c0_i32, %c0_i32_0, %c0_i32_1 : i32, i32, i32
  }
  func.func @transform_2(%arg0: i32, %arg1: i32, %arg2: i32) -> (i32, i32, i32) {
    %c0_i32 = arith.constant 0 : i32
    %c0_i32_0 = arith.constant 0 : i32
    %c0_i32_1 = arith.constant 0 : i32
    %c0_i32_2 = arith.constant 0 : i32
    return %c0_i32, %c0_i32_0, %c0_i32_1 : i32, i32, i32
  }
  func.func @transform_3(%arg0: i32, %arg1: i32, %arg2: i32) -> (i32, i32, i32) {
    %c0_i32 = arith.constant 0 : i32
    %c0_i32_0 = arith.constant 0 : i32
    %c0_i32_1 = arith.constant 0 : i32
    %c0_i32_2 = arith.constant 0 : i32
    return %c0_i32, %c0_i32_0, %c0_i32_1 : i32, i32, i32
  }
  func.func @transform_4(%arg0: i32, %arg1: i32, %arg2: i32) -> (i32, i32) {
    %c0_i32 = arith.constant 0 : i32
    %c0_i32_0 = arith.constant 0 : i32
    %c0_i32_1 = arith.constant 0 : i32
    return %c0_i32, %c0_i32_0 : i32, i32
  }
  func.func @transform_5(%arg0: i32, %arg1: i32, %arg2: i32) -> (i32, i32, i32) {
    %c0_i32 = arith.constant 0 : i32
    %c0_i32_0 = arith.constant 0 : i32
    return %arg0, %arg1, %c0_i32 : i32, i32, i32
  }
  func.func @transform_6(%arg0: i32, %arg1: i32, %arg2: i32) -> (i32, i32, i32, i32) {
    %c0_i32 = arith.constant 0 : i32
    %c0_i32_0 = arith.constant 0 : i32
    %c0_i32_1 = arith.constant 0 : i32
    return %arg0, %arg1, %c0_i32, %c0_i32_0 : i32, i32, i32, i32
  }
}

module attributes {stable_mosaic.version = 11 : i64} {
  func.func @_layer_norm_kernel(%arg0: i32, %arg1: i32, %arg2: memref<2xf32, #tpu.memory_space<smem>>, %arg3: memref<2xf32, #tpu.memory_space<smem>>, %arg4: memref<1x8x4096xbf16, #tpu.memory_space<vmem>>, %arg5: memref<1x8x4096xf32, #tpu.memory_space<vmem>>) attributes {dimension_semantics = [#tpu.dimension_semantics<parallel>, #tpu.dimension_semantics<parallel>], iteration_bounds = array<i64: 2, 1>, scalar_prefetch = 2 : i64, scratch_operands = 0 : i64, tpu.core_type = #tpu.core_type<tc>, window_params = [{transform_indices = @transform_0, window_bounds = array<i64: 1, 8, 4096>}, {transform_indices = @transform_1, window_bounds = array<i64: 1, 8, 4096>}]} {
    %c0 = arith.constant 0 : index
    %c0_0 = arith.constant 0 : index
    %c0_1 = arith.constant 0 : index
    %0 = vector.load %arg4[%c0, %c0_0, %c0_1] : memref<1x8x4096xbf16, #tpu.memory_space<vmem>>, vector<1x8x4096xbf16>
    %1 = vector.shape_cast %0 : vector<1x8x4096xbf16> to vector<8x4096xbf16>
    %2 = arith.extf %1 : vector<8x4096xbf16> to vector<8x4096xf32>
    %3 = arith.index_cast %arg0 : i32 to index
    %4 = memref.load %arg2[%3] : memref<2xf32, #tpu.memory_space<smem>>
    %5 = vector.broadcast %4 : f32 to vector<8x4096xf32>
    %6 = arith.mulf %2, %5 : vector<8x4096xf32>
    %7 = arith.index_cast %arg0 : i32 to index
    %8 = memref.load %arg3[%7] : memref<2xf32, #tpu.memory_space<smem>>
    %9 = vector.broadcast %8 : f32 to vector<8x4096xf32>
    %10 = arith.addf %6, %9 : vector<8x4096xf32>
    %c0_2 = arith.constant 0 : index
    %c0_3 = arith.constant 0 : index
    %c0_4 = arith.constant 0 : index
    %11 = vector.load %arg5[%c0_2, %c0_3, %c0_4] : memref<1x8x4096xf32, #tpu.memory_space<vmem>>, vector<1x8x4096xf32>
    %12 = vector.shape_cast %11 : vector<1x8x4096xf32> to vector<8x4096xf32>
    %13 = vector.shape_cast %10 : vector<8x4096xf32> to vector<1x8x4096xf32>
    tpu.vector_store %arg5[%c0_2, %c0_3, %c0_4], %13 {strides = array<i32>} : memref<1x8x4096xf32, #tpu.memory_space<vmem>>, vector<1x8x4096xf32>,
    return
  }
  func.func @transform_0(%arg0: i32, %arg1: i32, %arg2: memref<2xf32, #tpu.memory_space<smem>>, %arg3: memref<2xf32, #tpu.memory_space<smem>>) -> (i32, i32, i32) {
    %c0_i32 = arith.constant 0 : i32
    %c0_i32_0 = arith.constant 0 : i32
    return %arg0, %arg1, %c0_i32 : i32, i32, i32
  }
  func.func @transform_1(%arg0: i32, %arg1: i32, %arg2: memref<2xf32, #tpu.memory_space<smem>>, %arg3: memref<2xf32, #tpu.memory_space<smem>>) -> (i32, i32, i32) {
    %c0_i32 = arith.constant 0 : i32
    %c0_i32_0 = arith.constant 0 : i32
    return %arg0, %arg1, %c0_i32 : i32, i32, i32
  }
}

</mosaic_0001>

<bundles_post_ra>
// kernel: position_wise_feed_forward.3
= control target key start
LH: loop header
LB: loop body
LE: loop exit
PB: predicated region body
PF: predicated region fallthrough
CT: control target
= control target key end

     0   :  { %s675_s0 = inlined_call_operand.vmem [shape: f32[2], index: 0, kind: input, shape index: {}]   ;;  %s676_s2 = inlined_call_operand.vmem [shape: bf16[2,8,4096], index: 2, kind: input, shape index: {}]   ;;  %s677_s3 = inlined_call_operand.vmem [shape: f32[2,8,4096], index: 3, kind: output, shape index: {}]   ;;  %s678_s1 = inlined_call_operand.vmem [shape: f32[2], index: 1, kind: input, shape index: {}]  }
   0x1   :  { %s8_s14 = sshll.u32 %s675_s0, 4  ;;  %s12_s17 = sshll.u32 %s678_s1, 4  ;;  %s9_s14 = int_to_ptr.vmem [resolvable:$true] %s8_s14  ;;  %s13_s17 = int_to_ptr.vmem [resolvable:$true] %s12_s17 }
   0x2   :  { %s444_s18 = scalar_lea.vmem %s9_s14, 16  ;;  %p449_p1 = scmp.lt.s32.totalorder %s9_s14, %s9_s14 }
   0x3   :  { %p445_p0 = scmp.ne.s32.totalorder %s9_s14, %s444_s18  ;;  %p450_p2 = scmp.lt.s32.totalorder %s444_s18, %s444_s18 }
   0x5   :  { %p451_p3 = por %p450_p2, %p449_p1 }
   0x7   :  { %p452_p4 = pnand %p451_p3, %p445_p0 }
   0x9   :  { %455 = shalt.err (!%p452_p4)  }
   0xa   :  { %s494_s19 = smov [#allocation3]   ;;  %s456_s20 = scalar_lea.vmem %s13_s17, 16 }
   0xb   :  { %11 = dma.vmem_to_smem %s9_s14, 16, %s494_s19, [#allocation2] }
   0xc   :  { %p457_p5 = scmp.ne.s32.totalorder %s13_s17, %s456_s20  ;;  %p461_p6 = scmp.lt.s32.totalorder %s13_s17, %s13_s17 }
   0xd   :  { %p462_p7 = scmp.lt.s32.totalorder %s456_s20, %s456_s20 }
   0xf   :  { %p463_p8 = por %p462_p7, %p461_p6 }
  0x11   :  { %p464_p9 = pnand %p463_p8, %p457_p5 }
  0x13   :  { %467 = shalt.err (!%p464_p9)  }
  0x14   :  { %s495_s0 = smov [#allocation4]  }
  0x15   :  { %15 = dma.vmem_to_smem %s13_s17, 16, %s495_s0, [#allocation2] }
  0x16   :  { %480 = dma.done.wait [#allocation2], 32 }
  0x17   :  { %481 = vsyncadd [#allocation2], 4294967264 }
  0x18   :  { %17 = sfence }
  0x19   :  { %s522_s1 = smov 0   ;;  %s524_s21 = smov 0  }
  0x1a   :  { %s526_s22 = smov 0  }
  0x1b LB: > { %s35_s23 = sadd.s32 1, %s488_s21  ;;  %p409_p10 = scmp.ge.s32.totalorder %s492_s22, 1  ;;  %s492_s22 = sphi %s526_s22, %s23_s22   ;;  %s488_s21 = sphi %s524_s21, %s680_s21   ;;  %s484_s1 = sphi %s522_s1, %s679_s1  }
  0x1c   : > { %p37_p11 = scmp.ge.s32.totalorder %s35_s23, 2  ;;  %p119_p12 = scmp.lt.s32.totalorder %s492_s22, 3 }
  0x1e   : > { %s682_s23 = smov (%p37_p11, %s35_s23), 0  ;;  %p120_p13 = pnand %p409_p10, %p119_p12 }
  0x1f   : > { %p147_p0 = scmp.lt.s32.totalorder (!%p120_p13), %s484_s1, 1  ;;  %s213_s24 = sld [smem:[#allocation3 + %s484_s1]] (!%p120_p13) }
  0x20   : > { %123 = sbr.rel (%p120_p13) target bundleno = 71 (0x47), region = 24  ;;  %s247_s25 = sld [smem:[#allocation4 + %s484_s1]] (!%p120_p13) }
  0x25   : > { %v546_v1 = vstv (!%p120_p13), %s213_s24 }
  0x26   : > { %v550_v5 = vstv (!%p120_p13), %s247_s25 }
  0x27   : > { %s684_s1 = smov (!%p147_p0, %s484_s1), 1 }
  0x28   : > { %s416_s26 = sshll.u32 %s684_s1, 7  ;;  %s417_s30 = sshll.u32 %s684_s1, 8 }
  0x29   : > { %s543_s29 = scalar_lea.vmem %s676_s2, %s416_s26  ;;  %s559_s6 = scalar_lea.vmem %s677_s3, %s417_s30 }
  0x2a   : > { %v165_v0 = vld [vmem:[%s543_s29] sm:$0xff]  ;;  %v166_v2 = vld [vmem:[%s543_s29 + $0x8] sm:$0xff]  ;;  %v167_v3 = vld [vmem:[%s543_s29 + $0x10] sm:$0xff] }
  0x2b   : > { %v181_v4 = vunpack.c.l.bf16 %v165_v0  ;;  %v182_v6 = vunpack.c.h.bf16 %v165_v0  ;;  %v183_v7 = vunpack.c.l.bf16 %v166_v2  ;;  %v168_v8 = vld [vmem:[%s543_s29 + $0x18] sm:$0xff]  ;;  %v184_v9 = vunpack.c.h.bf16 %v166_v2  ;;  %v169_v21 = vld [vmem:[%s543_s29 + $0x20] sm:$0xff]  ;;  %v170_v22 = vld [vmem:[%s543_s29 + $0x28] sm:$0xff] }
  0x2c   : > { %v185_v10 = vunpack.c.l.bf16 %v167_v3  ;;  %v186_v11 = vunpack.c.h.bf16 %v167_v3  ;;  %v187_v12 = vunpack.c.l.bf16 %v168_v8  ;;  %v188_v16 = vunpack.c.h.bf16 %v168_v8  ;;  %v171_v27 = vld [vmem:[%s543_s29 + $0x30] sm:$0xff]  ;;  %v172_v28 = vld [vmem:[%s543_s29 + $0x38] sm:$0xff]  ;;  %v173_v49 = vld [vmem:[%s543_s29 + $0x40] sm:$0xff] }
  0x2d   : > { %v215_v13 = vmul.f32 %v546_v1, %v181_v4  ;;  %v216_v14 = vmul.f32 %v546_v1, %v182_v6  ;;  %v217_v15 = vmul.f32 %v546_v1, %v183_v7  ;;  %v218_v17 = vmul.f32 %v546_v1, %v184_v9  ;;  %v174_v50 = vld [vmem:[%s543_s29 + $0x48] sm:$0xff]  ;;  %v175_v55 = vld [vmem:[%s543_s29 + $0x50] sm:$0xff]  ;;  %v176_v56 = vld [vmem:[%s543_s29 + $0x58] sm:$0xff] }
  0x2e   : > { %v219_v18 = vmul.f32 %v546_v1, %v185_v10  ;;  %v220_v19 = vmul.f32 %v546_v1, %v186_v11  ;;  %v221_v20 = vmul.f32 %v546_v1, %v187_v12  ;;  %v222_v26 = vmul.f32 %v546_v1, %v188_v16  ;;  %v178_v16 = vld [vmem:[%s543_s29 + $0x68] sm:$0xff] }
  0x2f   : > { %v249_v23 = vadd.f32 %v550_v5, %v215_v13  ;;  %v250_v24 = vadd.f32 %v550_v5, %v216_v14  ;;  %v251_v25 = vadd.f32 %v550_v5, %v217_v15  ;;  %v252_v29 = vadd.f32 %v550_v5, %v218_v17  ;;  %v177_v15 = vld [vmem:[%s543_s29 + $0x60] sm:$0xff] }
  0x30   : > { %v253_v30 = vadd.f32 %v550_v5, %v219_v18  ;;  %v254_v31 = vadd.f32 %v550_v5, %v220_v19  ;;  %v255_v32 = vadd.f32 %v550_v5, %v221_v20  ;;  %v256_v33 = vadd.f32 %v550_v5, %v222_v26 }
  0x31   : > { %281 = vst [vmem:[%s559_s6] sm:$0xff] %v249_v23  ;;  %282 = vst [vmem:[%s559_s6 + $0x8] sm:$0xff] %v250_v24  ;;  %v189_v34 = vunpack.c.l.bf16 %v169_v21  ;;  %v190_v35 = vunpack.c.h.bf16 %v169_v21  ;;  %v191_v36 = vunpack.c.l.bf16 %v170_v22  ;;  %v192_v37 = vunpack.c.h.bf16 %v170_v22  ;;  %v179_v21 = vld [vmem:[%s543_s29 + $0x70] sm:$0xff]  ;;  %v180_v22 = vld [vmem:[%s543_s29 + $0x78] sm:$0xff] }
  0x32   : > { %283 = vst [vmem:[%s559_s6 + $0x10] sm:$0xff] %v251_v25  ;;  %284 = vst [vmem:[%s559_s6 + $0x18] sm:$0xff] %v252_v29  ;;  %v193_v38 = vunpack.c.l.bf16 %v171_v27  ;;  %v194_v39 = vunpack.c.h.bf16 %v171_v27  ;;  %v195_v40 = vunpack.c.l.bf16 %v172_v28  ;;  %v196_v44 = vunpack.c.h.bf16 %v172_v28 }
  0x33   : > { %285 = vst [vmem:[%s559_s6 + $0x20] sm:$0xff] %v253_v30  ;;  %286 = vst [vmem:[%s559_s6 + $0x28] sm:$0xff] %v254_v31  ;;  %v223_v41 = vmul.f32 %v546_v1, %v189_v34  ;;  %v224_v42 = vmul.f32 %v546_v1, %v190_v35  ;;  %v225_v43 = vmul.f32 %v546_v1, %v191_v36  ;;  %v197_v62 = vunpack.c.l.bf16 %v173_v49 }
  0x34   : > { %287 = vst [vmem:[%s559_s6 + $0x30] sm:$0xff] %v255_v32  ;;  %288 = vst [vmem:[%s559_s6 + $0x38] sm:$0xff] %v256_v33  ;;  %v226_v45 = vmul.f32 %v546_v1, %v192_v37  ;;  %v227_v46 = vmul.f32 %v546_v1, %v193_v38  ;;  %v228_v47 = vmul.f32 %v546_v1, %v194_v39  ;;  %v198_v63 = vunpack.c.h.bf16 %v173_v49 }
  0x35   : > { %v229_v48 = vmul.f32 %v546_v1, %v195_v40  ;;  %v257_v51 = vadd.f32 %v550_v5, %v223_v41  ;;  %v258_v52 = vadd.f32 %v550_v5, %v224_v42  ;;  %v259_v53 = vadd.f32 %v550_v5, %v225_v43 }
  0x36   : > { %v230_v54 = vmul.f32 %v546_v1, %v196_v44  ;;  %v260_v57 = vadd.f32 %v550_v5, %v226_v45  ;;  %v261_v58 = vadd.f32 %v550_v5, %v227_v46  ;;  %v262_v59 = vadd.f32 %v550_v5, %v228_v47 }
  0x37   : > { %v263_v60 = vadd.f32 %v550_v5, %v229_v48  ;;  %289 = vst [vmem:[%s559_s6 + $0x40] sm:$0xff] %v257_v51  ;;  %290 = vst [vmem:[%s559_s6 + $0x48] sm:$0xff] %v258_v52  ;;  %v199_v0 = vunpack.c.l.bf16 %v174_v50  ;;  %v200_v2 = vunpack.c.h.bf16 %v174_v50  ;;  %v201_v3 = vunpack.c.l.bf16 %v175_v55 }
  0x38   : > { %291 = vst [vmem:[%s559_s6 + $0x50] sm:$0xff] %v259_v53  ;;  %v264_v61 = vadd.f32 %v550_v5, %v230_v54  ;;  %292 = vst [vmem:[%s559_s6 + $0x58] sm:$0xff] %v260_v57  ;;  %v202_v4 = vunpack.c.h.bf16 %v175_v55  ;;  %v203_v6 = vunpack.c.l.bf16 %v176_v56  ;;  %v231_v7 = vmul.f32 %v546_v1, %v197_v62 }
  0x39   : > { %293 = vst [vmem:[%s559_s6 + $0x60] sm:$0xff] %v261_v58  ;;  %294 = vst [vmem:[%s559_s6 + $0x68] sm:$0xff] %v262_v59  ;;  %v232_v8 = vmul.f32 %v546_v1, %v198_v63  ;;  %v233_v9 = vmul.f32 %v546_v1, %v199_v0  ;;  %v204_v10 = vunpack.c.h.bf16 %v176_v56  ;;  %v234_v11 = vmul.f32 %v546_v1, %v200_v2 }
  0x3a   : > { %295 = vst [vmem:[%s559_s6 + $0x70] sm:$0xff] %v263_v60  ;;  %296 = vst [vmem:[%s559_s6 + $0x78] sm:$0xff] %v264_v61  ;;  %v235_v12 = vmul.f32 %v546_v1, %v201_v3  ;;  %v236_v13 = vmul.f32 %v546_v1, %v202_v4  ;;  %v237_v14 = vmul.f32 %v546_v1, %v203_v6  ;;  %v205_v28 = vunpack.c.l.bf16 %v177_v15 }
  0x3b   : > { %v265_v17 = vadd.f32 %v550_v5, %v231_v7  ;;  %v266_v18 = vadd.f32 %v550_v5, %v232_v8  ;;  %v267_v19 = vadd.f32 %v550_v5, %v233_v9  ;;  %v238_v20 = vmul.f32 %v546_v1, %v204_v10 }
  0x3c   : > { %v268_v23 = vadd.f32 %v550_v5, %v234_v11  ;;  %v269_v24 = vadd.f32 %v550_v5, %v235_v12  ;;  %v270_v25 = vadd.f32 %v550_v5, %v236_v13  ;;  %v271_v26 = vadd.f32 %v550_v5, %v237_v14 }
  0x3d   : > { %297 = vst [vmem:[%s559_s6 + $0x80] sm:$0xff] %v265_v17  ;;  %298 = vst [vmem:[%s559_s6 + $0x88] sm:$0xff] %v266_v18  ;;  %v272_v27 = vadd.f32 %v550_v5, %v238_v20  ;;  %v206_v29 = vunpack.c.h.bf16 %v177_v15  ;;  %v207_v30 = vunpack.c.l.bf16 %v178_v16  ;;  %v208_v31 = vunpack.c.h.bf16 %v178_v16 }
  0x3e   : > { %299 = vst [vmem:[%s559_s6 + $0x90] sm:$0xff] %v267_v19  ;;  %300 = vst [vmem:[%s559_s6 + $0x98] sm:$0xff] %v268_v23  ;;  %v209_v32 = vunpack.c.l.bf16 %v179_v21  ;;  %v210_v33 = vunpack.c.h.bf16 %v179_v21  ;;  %v211_v34 = vunpack.c.l.bf16 %v180_v22  ;;  %v239_v35 = vmul.f32 %v546_v1, %v205_v28 }
  0x3f   : > { %301 = vst [vmem:[%s559_s6 + $0xa0] sm:$0xff] %v269_v24  ;;  %302 = vst [vmem:[%s559_s6 + $0xa8] sm:$0xff] %v270_v25  ;;  %v240_v36 = vmul.f32 %v546_v1, %v206_v29  ;;  %v241_v37 = vmul.f32 %v546_v1, %v207_v30  ;;  %v212_v38 = vunpack.c.h.bf16 %v180_v22  ;;  %v242_v39 = vmul.f32 %v546_v1, %v208_v31 }
  0x40   : > { %303 = vst [vmem:[%s559_s6 + $0xb0] sm:$0xff] %v271_v26  ;;  %304 = vst [vmem:[%s559_s6 + $0xb8] sm:$0xff] %v272_v27  ;;  %v243_v40 = vmul.f32 %v546_v1, %v209_v32  ;;  %v244_v41 = vmul.f32 %v546_v1, %v210_v33  ;;  %v245_v42 = vmul.f32 %v546_v1, %v211_v34 }
  0x41   : > { %v273_v43 = vadd.f32 %v550_v5, %v239_v35  ;;  %v274_v44 = vadd.f32 %v550_v5, %v240_v36  ;;  %v275_v45 = vadd.f32 %v550_v5, %v241_v37  ;;  %v246_v46 = vmul.f32 %v546_v1, %v212_v38 }
  0x42   : > { %v276_v47 = vadd.f32 %v550_v5, %v242_v39  ;;  %v277_v48 = vadd.f32 %v550_v5, %v243_v40  ;;  %v278_v49 = vadd.f32 %v550_v5, %v244_v41  ;;  %v279_v50 = vadd.f32 %v550_v5, %v245_v42 }
  0x43   : > { %305 = vst [vmem:[%s559_s6 + $0xc0] sm:$0xff] %v273_v43  ;;  %306 = vst [vmem:[%s559_s6 + $0xc8] sm:$0xff] %v274_v44  ;;  %v280_v51 = vadd.f32 %v550_v5, %v246_v46 }
  0x44   : > { %307 = vst [vmem:[%s559_s6 + $0xd0] sm:$0xff] %v275_v45  ;;  %308 = vst [vmem:[%s559_s6 + $0xd8] sm:$0xff] %v276_v47 }
  0x45   : > { %309 = vst [vmem:[%s559_s6 + $0xe0] sm:$0xff] %v277_v48  ;;  %310 = vst [vmem:[%s559_s6 + $0xe8] sm:$0xff] %v278_v49 }
  0x46   : > { %311 = vst [vmem:[%s559_s6 + $0xf0] sm:$0xff] %v279_v50  ;;  %312 = vst [vmem:[%s559_s6 + $0xf8] sm:$0xff] %v280_v51 }
  0x47 PF: > { %s23_s22 = sadd.s32 1, %s492_s22   ;;  %s679_s1 = smov %s488_s21 }
  0x48   : > { %p20_p1 = scmp.ge.s32.totalorder %s23_s22, 4   ;;  %s680_s21 = smov %s682_s23 }
  0x4a   :  { %22 = sbr.rel (!%p20_p1) target bundleno = 27 (0x1b), region = 54 }

// kernel: position_wise_feed_forward.2
= control target key start
LH: loop header
LB: loop body
LE: loop exit
PB: predicated region body
PF: predicated region fallthrough
CT: control target
= control target key end

     0   :  { %s1633_s21 = smov 0   ;;  %s1635_s22 = smov 0   ;;  %s1886_s0 = inlined_call_operand.vmem [shape: f32[2,256,128], index: 0, kind: input, shape index: {}]   ;;  %s1887_s1 = inlined_call_operand.vmem [shape: bf16[2,128,256], index: 1, kind: input, shape index: {}]   ;;  %s1888_s2 = inlined_call_operand.vmem [shape: f32[2,1,256], index: 2, kind: input, shape index: {}]   ;;  %s1889_s3 = inlined_call_operand.vmem [shape: bf16[2,256,128], index: 3, kind: input, shape index: {}]   ;;  %s1890_s4 = inlined_call_operand.vmem [shape: f32[1,128], index: 4, kind: input, shape index: {}]   ;;  %s1891_s5 = inlined_call_operand.vmem [shape: bf16[2,256,128], index: 5, kind: output, shape index: {0}]   ;;  %s1892_s6 = inlined_call_operand.vmem [shape: f32[2,2,8,128], index: 6, kind: output, shape index: {1}]  }
   0x1   :  { %s1637_s23 = smov 0   ;;  %s1639_s24 = smov 0  }
   0x2   :  { %s1641_s25 = smov 0   ;;  %s1643_s26 = smov 0  }
   0x3   :  { %s1645_s27 = smov 0  }
   0x4 LB: > { %s29_s28 = sadd.s32 1, %s1583_s24  ;;  %s32_s29 = sadd.s32 1, %s1587_s25  ;;  %s1595_s27 = sphi %s1645_s27, %s17_s27   ;;  %s1591_s26 = sphi %s1643_s26, %s1898_s26   ;;  %s1587_s25 = sphi %s1641_s25, %s1897_s25   ;;  %s1583_s24 = sphi %s1639_s24, %s1896_s24   ;;  %s1579_s23 = sphi %s1637_s23, %s1895_s23   ;;  %s1575_s22 = sphi %s1635_s22, %s1894_s22   ;;  %s1571_s21 = sphi %s1633_s21, %s1893_s21  }
   0x5   : > { %p30_p0 = scmp.ge.s32.totalorder %s29_s28, 2  ;;  %p1249_p1 = scmp.ge.s32.totalorder %s1595_s27, 1 }
   0x6   : > { %p245_p2 = scmp.lt.s32.totalorder %s1595_s27, 9  ;;  %s36_s30 = sadd.s32 1, %s1591_s26 }
   0x7   : > { %s1900_s28 = smov (%p30_p0, %s29_s28), 0  ;;  %s1902_s29 = smov (!%p30_p0, %s32_s29), %s1587_s25 }
   0x8   : > { %p246_p3 = pnand %p1249_p1, %p245_p2  ;;  %p34_p4 = scmp.ge.s32.totalorder %s1902_s29, 2 }
   0x9   : > { %s1250_s7 = sshll.u32 (!%p246_p3), %s1575_s22, 4  ;;  %p292_p6 = scmp.lt.s32.totalorder (!%p246_p3), %s1579_s23, 1 }
   0xa   : > { %s1904_s29 = smov (%p34_p4, %s1902_s29), 0  ;;  %s1906_s30 = smov (!%p34_p4, %s36_s30), %s1591_s26 }
   0xb   : > { %p38_p5 = scmp.ge.s32.totalorder %s1906_s30, 2  ;;  %249 = sbr.rel (%p246_p3) target bundleno = 592 (0x250), region = 40 }
   0xc   : > { %p294_p7 = scmp.lt.s32.totalorder (!%p246_p3), %s1250_s7, 31  ;;  %p313_p8 = scmp.lt.s32.totalorder (!%p246_p3), %s1575_s22, 1 }
   0xd   : > { %s1908_s30 = smov (%p38_p5, %s1906_s30), 0  ;;  %p1258_p9 = scmp.ne.s32.totalorder (!%p246_p3), %s1571_s21, 0 }
  0x12   : > { %s1910_s23 = smov (!%p292_p6, %s1579_s23), 1  ;;  %s1912_s7 = smov (!%p294_p7, %s1250_s7), 31 }
  0x13   : > { %s1251_s8 = sshll.u32 %s1910_s23, 5  ;;  %s1256_s10 = sshll.u32 %s1910_s23, 1  ;;  %v1259_v16 = vld [vmem:[%s1890_s4] ss:$0 sm:$0xff] (!%p1258_p9) }
  0x14   : > { %s297_s9 = sadd.s32 %s1251_s8, %s1912_s7  ;;  %s1914_s22 = smov (!%p313_p8, %s1575_s22), 1 }
  0x15   : > { %s1252_s11 = sshll.u32 %s297_s9, 3  ;;  %s1255_s12 = sshll.u32 %s297_s9, 2 }
  0x16   : > { %s299_s15 = scalar_lea.vmem %s1886_s0, %s1252_s11  ;;  %s1687_s18 = scalar_lea.vmem %s1891_s5, %s1255_s12 }
  0x17   : > { %v1690_v0 = vld [vmem:[%s299_s15] sm:$0xff]  ;;  %v1692_v1 = vld [vmem:[%s299_s15 + $0x8] sm:$0xff]  ;;  %v1694_v2 = vld [vmem:[%s299_s15 + $0x10] sm:$0xff]  ;;  %s316_s19 = sadd.s32 %s1256_s10, %s1914_s22  ;;  %339 = sbr.rel (%p1258_p9) target bundleno = 35 (0x23), region = 44 }
  0x18   : > { %v1696_v3 = vld [vmem:[%s299_s15 + $0x18] sm:$0xff]  ;;  %v1698_v4 = vld [vmem:[%s299_s15 + $0x20] sm:$0xff]  ;;  %v1700_v5 = vld [vmem:[%s299_s15 + $0x28] sm:$0xff]  ;;  %s1257_s20 = sshll.u32 %s316_s19, 3  ;;  %v347_v17 = vadd.f32 (!%p1258_p9), %v1259_v16, %v1690_v0  ;;  %v348_v18 = vadd.f32 (!%p1258_p9), %v1259_v16, %v1692_v1  ;;  %v349_v19 = vadd.f32 (!%p1258_p9), %v1259_v16, %v1694_v2 }
  0x19   : > { %v1702_v6 = vld [vmem:[%s299_s15 + $0x30] sm:$0xff]  ;;  %v1704_v7 = vld [vmem:[%s299_s15 + $0x38] sm:$0xff]  ;;  %v1706_v8 = vld [vmem:[%s299_s15 + $0x40] sm:$0xff]  ;;  %s1717_s8 = scalar_lea.vmem %s1892_s6, %s1257_s20  ;;  %v350_v20 = vadd.f32 (!%p1258_p9), %v1259_v16, %v1696_v3  ;;  %v351_v21 = vadd.f32 (!%p1258_p9), %v1259_v16, %v1698_v4  ;;  %v352_v22 = vadd.f32 (!%p1258_p9), %v1259_v16, %v1700_v5 }
  0x1a   : > { %v1708_v9 = vld [vmem:[%s299_s15 + $0x48] sm:$0xff]  ;;  %v1710_v10 = vld [vmem:[%s299_s15 + $0x50] sm:$0xff]  ;;  %v1712_v11 = vld [vmem:[%s299_s15 + $0x58] sm:$0xff]  ;;  %v353_v23 = vadd.f32 (!%p1258_p9), %v1259_v16, %v1702_v6  ;;  %v354_v24 = vadd.f32 (!%p1258_p9), %v1259_v16, %v1704_v7  ;;  %363 = vst [vmem:[#allocation2] sm:$0xff] (!%p1258_p9), %v347_v17  ;;  %v355_v25 = vadd.f32 (!%p1258_p9), %v1259_v16, %v1706_v8 }
  0x1b   : > { %v1719_v12 = vld [vmem:[%s299_s15 + $0x60] sm:$0xff]  ;;  %v1721_v13 = vld [vmem:[%s299_s15 + $0x68] sm:$0xff]  ;;  %v1723_v14 = vld [vmem:[%s299_s15 + $0x70] sm:$0xff]  ;;  %364 = vst [vmem:[#allocation2 + $0x8] sm:$0xff] (!%p1258_p9), %v348_v18  ;;  %v356_v26 = vadd.f32 (!%p1258_p9), %v1259_v16, %v1708_v9  ;;  %v357_v27 = vadd.f32 (!%p1258_p9), %v1259_v16, %v1710_v10  ;;  %v358_v28 = vadd.f32 (!%p1258_p9), %v1259_v16, %v1712_v11 }
  0x1c   : > { %v1725_v15 = vld [vmem:[%s299_s15 + $0x78] sm:$0xff]  ;;  %365 = vst [vmem:[#allocation2 + $0x10] sm:$0xff] (!%p1258_p9), %v349_v19  ;;  %366 = vst [vmem:[#allocation2 + $0x18] sm:$0xff] (!%p1258_p9), %v350_v20  ;;  %v359_v29 = vadd.f32 (!%p1258_p9), %v1259_v16, %v1719_v12  ;;  %v360_v30 = vadd.f32 (!%p1258_p9), %v1259_v16, %v1721_v13  ;;  %v361_v31 = vadd.f32 (!%p1258_p9), %v1259_v16, %v1723_v14 }
  0x1d   : > { %367 = vst [vmem:[#allocation2 + $0x20] sm:$0xff] (!%p1258_p9), %v351_v21  ;;  %368 = vst [vmem:[#allocation2 + $0x28] sm:$0xff] (!%p1258_p9), %v352_v22  ;;  %v362_v32 = vadd.f32 (!%p1258_p9), %v1259_v16, %v1725_v15 }
  0x1e   : > { %369 = vst [vmem:[#allocation2 + $0x30] sm:$0xff] %v353_v23  ;;  %370 = vst [vmem:[#allocation2 + $0x38] sm:$0xff] %v354_v24 }
  0x1f   : > { %371 = vst [vmem:[#allocation2 + $0x40] sm:$0xff] %v355_v25  ;;  %372 = vst [vmem:[#allocation2 + $0x48] sm:$0xff] %v356_v26 }
  0x20   : > { %373 = vst [vmem:[#allocation2 + $0x50] sm:$0xff] %v357_v27  ;;  %374 = vst [vmem:[#allocation2 + $0x58] sm:$0xff] %v358_v28 }
  0x21   : > { %375 = vst [vmem:[#allocation2 + $0x60] sm:$0xff] %v359_v29  ;;  %376 = vst [vmem:[#allocation2 + $0x68] sm:$0xff] %v360_v30 }
  0x22   : > { %377 = vst [vmem:[#allocation2 + $0x70] sm:$0xff] %v361_v31  ;;  %378 = vst [vmem:[#allocation2 + $0x78] sm:$0xff] %v362_v32 }
  0x23 PF: > { %s1315_s10 = sshll.u32 %s1571_s21, 7  ;;  %v1597_v33 = vmov 0   ;;  %v435_v61 = vpack.c.bf16 %v1692_v1, %v1690_v0  ;;  %v436_v62 = vpack.c.bf16 %v1696_v3, %v1694_v2  ;;  %v437_v63 = vpack.c.bf16 %v1700_v5, %v1698_v4  ;;  %s1262_s17 = sshll.u32 %s1571_s21, 1 }
  0x24   : > { %s1751_s13 = scalar_lea.vmem %s1887_s1, %s1315_s10  ;;  %566 = vmatprep.mubr.bf16.mxu0 %v1597_v33  ;;  %s1763_s16 = scalar_lea.vmem %s1889_s3, %s1315_s10  ;;  %v438_v0 = vpack.c.bf16 %v1704_v7, %v1702_v6  ;;  %v439_v1 = vpack.c.bf16 %v1708_v9, %v1706_v8  ;;  %v440_v2 = vpack.c.bf16 %v1712_v11, %v1710_v10  ;;  %v441_v3 = vpack.c.bf16 %v1721_v13, %v1719_v12 }
  0x25   : > { %v1501_v34 = vld [vmem:[%s1751_s13 + $0x4] ss:$8 sps:$4 sm:$0xff]   ;;  %v1503_v35 = vld [vmem:[%s1751_s13] ss:$8 sps:$4 sm:$0xff]   ;;  %v1504_v36 = vld [vmem:[%s1751_s13 + $0x14] ss:$8 sps:$4 sm:$0xff]   ;;  %v442_v4 = vpack.c.bf16 %v1725_v15, %v1723_v14  ;;  %v444_v10 = vlaneseq  ;;  %s399_s23 = scalar_lea.vmem %s1888_s2, %s1262_s17 }
  0x26   : > { %534 = vmatprep.subr.bf16.mxu0 %v1501_v34  ;;  %v1506_v37 = vld [vmem:[%s1751_s13 + $0x10] ss:$8 sps:$4 sm:$0xff]   ;;  %v1507_v38 = vld [vmem:[%s1751_s13 + $0x24] ss:$8 sps:$4 sm:$0xff]   ;;  %v1509_v39 = vld [vmem:[%s1751_s13 + $0x20] ss:$8 sps:$4 sm:$0xff]  }
  0x27   : > { %535 = vmatpush1.bf16.msra.mxu0 %v1503_v35  ;;  %v1510_v40 = vld [vmem:[%s1751_s13 + $0x34] ss:$8 sps:$4 sm:$0xff]   ;;  %v1512_v41 = vld [vmem:[%s1751_s13 + $0x30] ss:$8 sps:$4 sm:$0xff]   ;;  %v1513_v42 = vld [vmem:[%s1751_s13 + $0x44] ss:$8 sps:$4 sm:$0xff]  }
  0x28   : > { %536 = vmatprep.subr.bf16.mxu0 %v1504_v36  ;;  %v1525_v43 = vld [vmem:[%s1763_s16 + $0x40] sm:$0xff]   ;;  %v1527_v46 = vld [vmem:[%s1763_s16 + $0x48] sm:$0xff]   ;;  %v1529_v48 = vld [vmem:[%s1763_s16 + $0x50] sm:$0xff]   ;;  %v445_v11 = vshrl.u32 %v444_v10, 7  ;;  %p1296_p10 = scmp.ne.s32.totalorder %s1571_s21, 1 }
  0x29   : > { %v1526_v44 = vld [vmem:[%s1763_s16] sm:$0xff]   ;;  %1380 = vmatprep.subr.bf16.mxu1 %v1525_v43  ;;  %v1528_v47 = vld [vmem:[%s1763_s16 + $0x8] sm:$0xff]   ;;  %v1516_v49 = vld [vmem:[%s1751_s13 + $0x54] ss:$8 sps:$4 sm:$0xff]  }
  0x2a   : > { %v1515_v45 = vld [vmem:[%s1751_s13 + $0x40] ss:$8 sps:$4 sm:$0xff]   ;;  %1381 = vmatpush3.bf16.msra.mxu1 %v1526_v44  ;;  %v1518_v50 = vld [vmem:[%s1751_s13 + $0x50] ss:$8 sps:$4 sm:$0xff]   ;;  %v1519_v53 = vld [vmem:[%s1751_s13 + $0x64] ss:$8 sps:$4 sm:$0xff]  }
  0x2b   : > { %537 = vmatpush1.bf16.msra.mxu0 %v1506_v37  ;;  %1382 = vmatprep.subr.bf16.mxu1 %v1527_v46  ;;  %v1530_v51 = vld [vmem:[%s1763_s16 + $0x10] sm:$0xff]   ;;  %v1531_v52 = vld [vmem:[%s1763_s16 + $0x58] sm:$0xff]   ;;  %v1521_v54 = vld [vmem:[%s1751_s13 + $0x60] ss:$8 sps:$4 sm:$0xff]   ;;  %v446_v12 = vsub.s32 0, %v445_v11  ;;  %v450_v14 = vsub.s32 1, %v445_v11 }
  0x2c   : > { %538 = vmatprep.subr.bf16.mxu0 %v1507_v38  ;;  %v1532_v55 = vld [vmem:[%s1763_s16 + $0x18] sm:$0xff]   ;;  %v1533_v56 = vld [vmem:[%s1763_s16 + $0x60] sm:$0xff]   ;;  %v1535_v60 = vld [vmem:[%s1763_s16 + $0x68] sm:$0xff]  }
  0x2d   : > { %v1522_v57 = vld [vmem:[%s1751_s13 + $0x74] ss:$8 sps:$4 sm:$0xff]   ;;  %v1534_v58 = vld [vmem:[%s1763_s16 + $0x20] sm:$0xff]   ;;  %v1524_v59 = vld [vmem:[%s1751_s13 + $0x70] ss:$8 sps:$4 sm:$0xff]  }
  0x2e   : > { %1383 = vmatpush3.bf16.msra.mxu1 %v1528_v47  ;;  %v1536_v5 = vld [vmem:[%s1763_s16 + $0x28] sm:$0xff]   ;;  %v1537_v6 = vld [vmem:[%s1763_s16 + $0x70] sm:$0xff]   ;;  %v1539_v8 = vld [vmem:[%s1763_s16 + $0x78] sm:$0xff]  }
  0x2f   : > { %539 = vmatpush1.bf16.msra.mxu0 %v1509_v39  ;;  %1384 = vmatprep.subr.bf16.mxu1 %v1529_v48  ;;  %v1538_v7 = vld [vmem:[%s1763_s16 + $0x30] sm:$0xff]   ;;  %v1540_v9 = vld [vmem:[%s1763_s16 + $0x38] sm:$0xff]   ;;  %v400_v13 = vld [vmem:[%s399_s23] sm:$0x3] }
  0x30   : > { %540 = vmatprep.subr.bf16.mxu0 %v1510_v40  ;;  %v1818_v15 = vrot.slane %v400_v13, %v446_v12  ;;  %v1820_v16 = vrot.slane %v400_v13, %v450_v14 }
  0x32   : > { %1385 = vmatpush3.bf16.msra.mxu1 %v1530_v51 }
  0x33   : > { %541 = vmatpush1.bf16.msra.mxu0 %v1512_v41  ;;  %1386 = vmatprep.subr.bf16.mxu1 %v1531_v52 }
  0x34   : > { %542 = vmatprep.subr.bf16.mxu0 %v1513_v42 }
  0x36   : > { %1387 = vmatpush3.bf16.msra.mxu1 %v1532_v55 }
  0x37   : > { %543 = vmatpush1.bf16.msra.mxu0 %v1515_v45  ;;  %1388 = vmatprep.subr.bf16.mxu1 %v1533_v56 }
  0x38   : > { %544 = vmatprep.subr.bf16.mxu0 %v1516_v49 }
  0x3a   : > { %1389 = vmatpush3.bf16.msra.mxu1 %v1534_v58 }
  0x3b   : > { %545 = vmatpush1.bf16.msra.mxu0 %v1518_v50  ;;  %1390 = vmatprep.subr.bf16.mxu1 %v1535_v60 }
  0x3c   : > { %546 = vmatprep.subr.bf16.mxu0 %v1519_v53 }
  0x3e   : > { %1391 = vmatpush3.bf16.msra.mxu1 %v1536_v5 }
  0x3f   : > { %547 = vmatpush1.bf16.msra.mxu0 %v1521_v54  ;;  %1392 = vmatprep.subr.bf16.mxu1 %v1537_v6 }
  0x40   : > { %548 = vmatprep.subr.bf16.mxu0 %v1522_v57 }
  0x42   : > { %1393 = vmatpush3.bf16.msra.mxu1 %v1538_v7 }
  0x43   : > { %549 = vmatpush1.bf16.msra.mxu0 %v1524_v59  ;;  %1394 = vmatprep.subr.bf16.mxu1 %v1539_v8 }
  0x46   : > { %567 = vmatmul.mubr.bf16.vlgmr.msra.gmra.mrb[0].mxu0 %v435_v61  ;;  %1395 = vmatpush3.bf16.msra.mxu1 %v1540_v9 }
  0x47   : > { %576 = vmatprep.mubr.bf16.mxu0 %v1597_v33 }
  0x4e   : > { %577 = vmatmul.mubr.bf16.gmra.mrb[4].mxu0 %v436_v62 }
  0x4f   : > { %586 = vmatprep.mubr.bf16.mxu0 %v1597_v33 }
  0x56   : > { %587 = vmatmul.mubr.bf16.gmra.mrb[8].mxu0 %v437_v63 }
  0x57   : > { %596 = vmatprep.mubr.bf16.mxu0 %v1597_v33 }
  0x5e   : > { %597 = vmatmul.mubr.bf16.gmra.mrb[12].mxu0 %v438_v0 }
  0x5f   : > { %606 = vmatprep.mubr.bf16.mxu0 %v1597_v33 }
  0x66   : > { %607 = vmatmul.mubr.bf16.gmra.mrb[16].mxu0 %v439_v1 }
  0x67   : > { %616 = vmatprep.mubr.bf16.mxu0 %v1597_v33 }
  0x6e   : > { %617 = vmatmul.mubr.bf16.gmra.mrb[20].mxu0 %v440_v2 }
  0x6f   : > { %626 = vmatprep.mubr.bf16.mxu0 %v1597_v33 }
  0x76   : > { %627 = vmatmul.mubr.bf16.gmra.mrb[24].mxu0 %v441_v3 }
  0x77   : > { %636 = vmatprep.mubr.bf16.mxu0 %v1597_v33 }
  0x7e   : > { %637 = vmatmul.mubr.bf16.gmra.mrb[28].mxu0 %v442_v4 }
 0x119   : > { %v568_v17 = vpop.f32.mrb[0].mxu0 }
 0x11a   : > { %v569_v18 = vadd.f32 %v568_v17, %v1818_v15  ;;  %v570_v19 = vpop.f32.mrb[1].mxu0 }
 0x11b   : > { %v571_v20 = vadd.f32 %v570_v19, %v1820_v16  ;;  %v572_v21 = vpop.f32.mrb[2].mxu0 }
 0x11c   : > { %v573_v22 = vadd.f32 %v572_v21, %v1818_v15  ;;  %v574_v23 = vpop.f32.mrb[3].mxu0  ;;  %v647_v25 = vmax.f32 %v569_v18, 0.0 }
 0x11d   : > { %v575_v24 = vadd.f32 %v574_v23, %v1820_v16  ;;  %v648_v27 = vmax.f32 %v571_v20, 0.0 }
 0x11e   : > { %v649_v26 = vmax.f32 %v573_v22, 0.0 }
 0x11f   : > { %v650_v28 = vmax.f32 %v575_v24, 0.0 }
 0x120   : > { %v695_v29 = vpack.c.bf16 %v649_v26, %v647_v25 }
 0x121   : > { %v578_v30 = vpop.f32.mrb[4].mxu0  ;;  %v696_v31 = vpack.c.bf16 %v650_v28, %v648_v27 }
 0x122   : > { %v579_v32 = vadd.f32 %v578_v30, %v1818_v15  ;;  %v580_v33 = vpop.f32.mrb[5].mxu0 }
 0x123   : > { %v581_v34 = vadd.f32 %v580_v33, %v1820_v16  ;;  %v582_v35 = vpop.f32.mrb[6].mxu0  ;;  %839 = vmatprep.mubr.bf16.mxu1 %v696_v31 }
 0x124   : > { %v583_v36 = vadd.f32 %v582_v35, %v1818_v15  ;;  %v584_v37 = vpop.f32.mrb[7].mxu0  ;;  %840 = vmatmul.mubr.bf16.vlgmr.msra.gmra.mrb[0].mxu1 %v695_v29  ;;  %v651_v39 = vmax.f32 %v579_v32, 0.0 }
 0x125   : > { %v585_v38 = vadd.f32 %v584_v37, %v1820_v16  ;;  %v652_v41 = vmax.f32 %v581_v34, 0.0 }
 0x126   : > { %v653_v40 = vmax.f32 %v583_v36, 0.0 }
 0x127   : > { %v654_v42 = vmax.f32 %v585_v38, 0.0 }
 0x128   : > { %v697_v43 = vpack.c.bf16 %v653_v40, %v651_v39 }
 0x129   : > { %v698_v44 = vpack.c.bf16 %v654_v42, %v652_v41  ;;  %v588_v45 = vpop.f32.mrb[8].mxu0 }
 0x12a   : > { %v589_v46 = vadd.f32 %v588_v45, %v1818_v15  ;;  %v590_v47 = vpop.f32.mrb[9].mxu0 }
 0x12b   : > { %v591_v48 = vadd.f32 %v590_v47, %v1820_v16  ;;  %v592_v49 = vpop.f32.mrb[10].mxu0  ;;  %847 = vmatprep.mubr.bf16.mxu1 %v698_v44 }
 0x12c   : > { %v593_v50 = vadd.f32 %v592_v49, %v1818_v15  ;;  %v594_v51 = vpop.f32.mrb[11].mxu0  ;;  %848 = vmatmul.mubr.bf16.gmra.mrb[4].mxu1 %v697_v43  ;;  %v655_v53 = vmax.f32 %v589_v46, 0.0 }
 0x12d   : > { %v595_v52 = vadd.f32 %v594_v51, %v1820_v16  ;;  %v656_v55 = vmax.f32 %v591_v48, 0.0 }
 0x12e   : > { %v657_v54 = vmax.f32 %v593_v50, 0.0 }
 0x12f   : > { %v658_v56 = vmax.f32 %v595_v52, 0.0 }
 0x130   : > { %v699_v57 = vpack.c.bf16 %v657_v54, %v655_v53 }
 0x131   : > { %v700_v58 = vpack.c.bf16 %v658_v56, %v656_v55  ;;  %v598_v59 = vpop.f32.mrb[12].mxu0 }
 0x132   : > { %v599_v60 = vadd.f32 %v598_v59, %v1818_v15  ;;  %v600_v61 = vpop.f32.mrb[13].mxu0 }
 0x133   : > { %v601_v62 = vadd.f32 %v600_v61, %v1820_v16  ;;  %v602_v63 = vpop.f32.mrb[14].mxu0  ;;  %855 = vmatprep.mubr.bf16.mxu1 %v700_v58 }
 0x134   : > { %v603_v0 = vadd.f32 %v602_v63, %v1818_v15  ;;  %v604_v1 = vpop.f32.mrb[15].mxu0  ;;  %856 = vmatmul.mubr.bf16.gmra.mrb[8].mxu1 %v699_v57  ;;  %v659_v3 = vmax.f32 %v599_v60, 0.0 }
 0x135   : > { %v605_v2 = vadd.f32 %v604_v1, %v1820_v16  ;;  %v660_v5 = vmax.f32 %v601_v62, 0.0 }
 0x136   : > { %v661_v4 = vmax.f32 %v603_v0, 0.0 }
 0x137   : > { %v662_v6 = vmax.f32 %v605_v2, 0.0 }
 0x138   : > { %v701_v7 = vpack.c.bf16 %v661_v4, %v659_v3  ;;  %v679_v4 = vld [vmem:[#allocation2] sm:$0xff] }
 0x139   : > { %v702_v8 = vpack.c.bf16 %v662_v6, %v660_v5  ;;  %v608_v9 = vpop.f32.mrb[16].mxu0 }
 0x13a   : > { %v609_v10 = vadd.f32 %v608_v9, %v1818_v15  ;;  %v610_v11 = vpop.f32.mrb[17].mxu0 }
 0x13b   : > { %v611_v12 = vadd.f32 %v610_v11, %v1820_v16  ;;  %v612_v13 = vpop.f32.mrb[18].mxu0  ;;  %863 = vmatprep.mubr.bf16.mxu1 %v702_v8  ;;  %v680_v8 = vld [vmem:[#allocation2 + $0x8] sm:$0xff] }
 0x13c   : > { %v613_v14 = vadd.f32 %v612_v13, %v1818_v15  ;;  %v614_v17 = vpop.f32.mrb[19].mxu0  ;;  %864 = vmatmul.mubr.bf16.gmra.mrb[12].mxu1 %v701_v7  ;;  %v663_v19 = vmax.f32 %v609_v10, 0.0 }
 0x13d   : > { %v615_v18 = vadd.f32 %v614_v17, %v1820_v16  ;;  %v664_v21 = vmax.f32 %v611_v12, 0.0  ;;  %v681_v12 = vld [vmem:[#allocation2 + $0x10] sm:$0xff] }
 0x13e   : > { %v665_v20 = vmax.f32 %v613_v14, 0.0 }
 0x13f   : > { %v666_v22 = vmax.f32 %v615_v18, 0.0  ;;  %v682_v18 = vld [vmem:[#allocation2 + $0x18] sm:$0xff] }
 0x140   : > { %v703_v23 = vpack.c.bf16 %v665_v20, %v663_v19 }
 0x141   : > { %v704_v24 = vpack.c.bf16 %v666_v22, %v664_v21  ;;  %v618_v25 = vpop.f32.mrb[20].mxu0 }
 0x142   : > { %v619_v26 = vadd.f32 %v618_v25, %v1818_v15  ;;  %v620_v27 = vpop.f32.mrb[21].mxu0 }
 0x143   : > { %v621_v28 = vadd.f32 %v620_v27, %v1820_v16  ;;  %v622_v29 = vpop.f32.mrb[22].mxu0  ;;  %871 = vmatprep.mubr.bf16.mxu1 %v704_v24  ;;  %v683_v24 = vld [vmem:[#allocation2 + $0x20] sm:$0xff] }
 0x144   : > { %v623_v30 = vadd.f32 %v622_v29, %v1818_v15  ;;  %v624_v31 = vpop.f32.mrb[23].mxu0  ;;  %872 = vmatmul.mubr.bf16.gmra.mrb[16].mxu1 %v703_v23  ;;  %v667_v33 = vmax.f32 %v619_v26, 0.0 }
 0x145   : > { %v625_v32 = vadd.f32 %v624_v31, %v1820_v16  ;;  %v668_v35 = vmax.f32 %v621_v28, 0.0  ;;  %v684_v28 = vld [vmem:[#allocation2 + $0x28] sm:$0xff] }
 0x146   : > { %v669_v34 = vmax.f32 %v623_v30, 0.0 }
 0x147   : > { %v670_v36 = vmax.f32 %v625_v32, 0.0 }
 0x148   : > { %v705_v37 = vpack.c.bf16 %v669_v34, %v667_v33  ;;  %v685_v34 = vld [vmem:[#allocation2 + $0x30] sm:$0xff] }
 0x149   : > { %v706_v38 = vpack.c.bf16 %v670_v36, %v668_v35  ;;  %v628_v39 = vpop.f32.mrb[24].mxu0 }
 0x14a   : > { %v629_v40 = vadd.f32 %v628_v39, %v1818_v15  ;;  %v630_v41 = vpop.f32.mrb[25].mxu0 }
 0x14b   : > { %v631_v42 = vadd.f32 %v630_v41, %v1820_v16  ;;  %v632_v43 = vpop.f32.mrb[26].mxu0  ;;  %879 = vmatprep.mubr.bf16.mxu1 %v706_v38  ;;  %v686_v38 = vld [vmem:[#allocation2 + $0x38] sm:$0xff] }
 0x14c   : > { %v633_v44 = vadd.f32 %v632_v43, %v1818_v15  ;;  %v634_v45 = vpop.f32.mrb[27].mxu0  ;;  %880 = vmatmul.mubr.bf16.gmra.mrb[20].mxu1 %v705_v37  ;;  %v671_v47 = vmax.f32 %v629_v40, 0.0 }
 0x14d   : > { %v635_v46 = vadd.f32 %v634_v45, %v1820_v16  ;;  %v672_v49 = vmax.f32 %v631_v42, 0.0 }
 0x14e   : > { %v673_v48 = vmax.f32 %v633_v44, 0.0  ;;  %v687_v44 = vld [vmem:[#allocation2 + $0x40] sm:$0xff] }
 0x14f   : > { %v674_v50 = vmax.f32 %v635_v46, 0.0 }
 0x150   : > { %v707_v51 = vpack.c.bf16 %v673_v48, %v671_v47  ;;  %v688_v48 = vld [vmem:[#allocation2 + $0x48] sm:$0xff] }
 0x151   : > { %v708_v52 = vpack.c.bf16 %v674_v50, %v672_v49  ;;  %v638_v53 = vpop.f32.mrb[28].mxu0 }
 0x152   : > { %v639_v54 = vadd.f32 %v638_v53, %v1818_v15  ;;  %v640_v55 = vpop.f32.mrb[29].mxu0 }
 0x153   : > { %v641_v56 = vadd.f32 %v640_v55, %v1820_v16  ;;  %v642_v57 = vpop.f32.mrb[30].mxu0  ;;  %887 = vmatprep.mubr.bf16.mxu1 %v708_v52 }
 0x154   : > { %v643_v58 = vadd.f32 %v642_v57, %v1818_v15  ;;  %v644_v59 = vpop.f32.mrb[31].mxu0  ;;  %888 = vmatmul.mubr.bf16.gmra.mrb[24].mxu1 %v707_v51  ;;  %v675_v61 = vmax.f32 %v639_v54, 0.0  ;;  %v689_v54 = vld [vmem:[#allocation2 + $0x50] sm:$0xff] }
 0x155   : > { %v645_v60 = vadd.f32 %v644_v59, %v1820_v16  ;;  %v676_v63 = vmax.f32 %v641_v56, 0.0 }
 0x156   : > { %v677_v62 = vmax.f32 %v643_v58, 0.0  ;;  %v690_v58 = vld [vmem:[#allocation2 + $0x58] sm:$0xff] }
 0x157   : > { %v678_v0 = vmax.f32 %v645_v60, 0.0 }
 0x158   : > { %v709_v1 = vpack.c.bf16 %v677_v62, %v675_v61 }
 0x159   : > { %v710_v2 = vpack.c.bf16 %v678_v0, %v676_v63  ;;  %v691_v0 = vld [vmem:[#allocation2 + $0x60] sm:$0xff] }
 0x15b   : > { %895 = vmatprep.mubr.bf16.mxu1 %v710_v2 }
 0x15c   : > { %896 = vmatmul.mubr.bf16.gmra.mrb[28].mxu1 %v709_v1 }
 0x1f7   : > { %v1396_v3 = vpop.f32.mrb[0].mxu1 }
 0x1f8   : > { %v1397_v5 = vpop.f32.mrb[1].mxu1 }
 0x1f9   : > { %v1398_v6 = vadd.f32 %v1397_v5, %v1396_v3  ;;  %v1399_v7 = vpop.f32.mrb[2].mxu1 }
 0x1fa   : > { %v1400_v9 = vpop.f32.mrb[3].mxu1 }
 0x1fb   : > { %v904_v15 = vadd.f32 %v1398_v6, %v679_v4  ;;  %v1401_v10 = vadd.f32 %v1400_v9, %v1399_v7  ;;  %v692_v4 = vld [vmem:[#allocation2 + $0x68] sm:$0xff] }
 0x1fd   : > { %920 = vst [vmem:[#allocation2] sm:$0xff] %v904_v15  ;;  %v905_v11 = vadd.f32 %v1401_v10, %v680_v8  ;;  %v693_v15 = vld [vmem:[#allocation2 + $0x70] sm:$0xff] }
 0x1ff   : > { %921 = vst [vmem:[#allocation2 + $0x8] sm:$0xff] %v905_v11  ;;  %v1402_v16 = vpop.f32.mrb[4].mxu1 }
 0x200   : > { %v1403_v13 = vpop.f32.mrb[5].mxu1 }
 0x201   : > { %v1404_v14 = vadd.f32 %v1403_v13, %v1402_v16  ;;  %v1405_v17 = vpop.f32.mrb[6].mxu1 }
 0x202   : > { %v1406_v19 = vpop.f32.mrb[7].mxu1 }
 0x203   : > { %v906_v20 = vadd.f32 %v1404_v14, %v681_v12  ;;  %v1407_v21 = vadd.f32 %v1406_v19, %v1405_v17  ;;  %v694_v12 = vld [vmem:[#allocation2 + $0x78] sm:$0xff] }
 0x204   : > { %v940_v19 = vld [vmem:[#allocation2] sm:$0xff] (!%p1296_p10) }
 0x205   : > { %922 = vst [vmem:[#allocation2 + $0x10] sm:$0xff] %v906_v20  ;;  %v907_v22 = vadd.f32 %v1407_v21, %v682_v18 }
 0x206   : > { %v941_v20 = vld [vmem:[#allocation2 + $0x8] sm:$0xff] (!%p1296_p10) }
 0x207   : > { %923 = vst [vmem:[#allocation2 + $0x18] sm:$0xff] %v907_v22  ;;  %v1408_v23 = vpop.f32.mrb[8].mxu1  ;;  %v1336_v22 = vpack.c.bf16 (!%p1296_p10), %v941_v20, %v940_v19 }
 0x208   : > { %v1409_v25 = vpop.f32.mrb[9].mxu1 }
 0x209   : > { %v1410_v26 = vadd.f32 %v1409_v25, %v1408_v23  ;;  %v1411_v27 = vpop.f32.mrb[10].mxu1  ;;  %v1036_v23 = vadd.f32 (!%p1296_p10), %v941_v20, %v940_v19  ;;  %v1059_v25 = vmul.f32 (!%p1296_p10), %v941_v20, %v941_v20  ;;  %1337 = vst [vmem:[%s1687_s18] sm:$0xff] (!%p1296_p10), %v1336_v22  }
 0x20a   : > { %v1412_v29 = vpop.f32.mrb[11].mxu1 }
 0x20b   : > { %v908_v30 = vadd.f32 %v1410_v26, %v683_v24  ;;  %v1413_v31 = vadd.f32 %v1412_v29, %v1411_v27  ;;  %v1058_v24 = vmul.f32 (!%p1296_p10), %v940_v19, %v940_v19 }
 0x20c   : > { %v942_v21 = vld [vmem:[#allocation2 + $0x10] sm:$0xff] (!%p1296_p10) }
 0x20d   : > { %924 = vst [vmem:[#allocation2 + $0x20] sm:$0xff] %v908_v30  ;;  %v909_v32 = vadd.f32 %v1413_v31, %v684_v28  ;;  %v1060_v30 = vmul.f32 (!%p1296_p10), %v942_v21, %v942_v21 }
 0x20e   : > { %v943_v26 = vld [vmem:[#allocation2 + $0x18] sm:$0xff] (!%p1296_p10) }
 0x20f   : > { %925 = vst [vmem:[#allocation2 + $0x28] sm:$0xff] %v909_v32  ;;  %v1414_v33 = vpop.f32.mrb[12].mxu1  ;;  %v1341_v29 = vpack.c.bf16 (!%p1296_p10), %v943_v26, %v942_v21 }
 0x210   : > { %v1415_v35 = vpop.f32.mrb[13].mxu1 }
 0x211   : > { %v1416_v36 = vadd.f32 %v1415_v35, %v1414_v33  ;;  %v1417_v37 = vpop.f32.mrb[14].mxu1  ;;  %v1074_v33 = vadd.f32 (!%p1296_p10), %v1059_v25, %v1058_v24  ;;  %v1061_v35 = vmul.f32 (!%p1296_p10), %v943_v26, %v943_v26  ;;  %1373 = vst [vmem:[%s1687_s18 + $0x8] sm:$0xff] (!%p1296_p10), %v1341_v29  }
 0x212   : > { %v1418_v39 = vpop.f32.mrb[15].mxu1 }
 0x213   : > { %v910_v40 = vadd.f32 %v1416_v36, %v685_v34  ;;  %v1419_v41 = vadd.f32 %v1418_v39, %v1417_v37  ;;  %v1037_v34 = vadd.f32 (!%p1296_p10), %v1036_v23, %v942_v21 }
 0x214   : > { %v944_v27 = vld [vmem:[#allocation2 + $0x20] sm:$0xff] (!%p1296_p10) }
 0x215   : > { %926 = vst [vmem:[#allocation2 + $0x30] sm:$0xff] %v910_v40  ;;  %v911_v42 = vadd.f32 %v1419_v41, %v686_v38 }
 0x216   : > { %v945_v28 = vld [vmem:[#allocation2 + $0x28] sm:$0xff] (!%p1296_p10) }
 0x217   : > { %927 = vst [vmem:[#allocation2 + $0x38] sm:$0xff] %v911_v42  ;;  %v1420_v43 = vpop.f32.mrb[16].mxu1  ;;  %v1346_v31 = vpack.c.bf16 (!%p1296_p10), %v945_v28, %v944_v27  ;;  %v1038_v42 = vadd.f32 (!%p1296_p10), %v1037_v34, %v943_v26 }
 0x218   : > { %v1421_v45 = vpop.f32.mrb[17].mxu1 }
 0x219   : > { %v1422_v46 = vadd.f32 %v1421_v45, %v1420_v43  ;;  %v1423_v47 = vpop.f32.mrb[18].mxu1  ;;  %1374 = vst [vmem:[%s1687_s18 + $0x10] sm:$0xff] (!%p1296_p10), %v1346_v31   ;;  %v1075_v43 = vadd.f32 (!%p1296_p10), %v1074_v33, %v1060_v30 }
 0x21a   : > { %v1424_v49 = vpop.f32.mrb[19].mxu1 }
 0x21b   : > { %v912_v50 = vadd.f32 %v1422_v46, %v687_v44  ;;  %v1425_v51 = vadd.f32 %v1424_v49, %v1423_v47  ;;  %v1062_v44 = vmul.f32 (!%p1296_p10), %v944_v27, %v944_v27 }
 0x21c   : > { %v946_v32 = vld [vmem:[#allocation2 + $0x30] sm:$0xff] (!%p1296_p10) }
 0x21d   : > { %928 = vst [vmem:[#allocation2 + $0x40] sm:$0xff] %v912_v50  ;;  %v913_v52 = vadd.f32 %v1425_v51, %v688_v48  ;;  %v1076_v50 = vadd.f32 (!%p1296_p10), %v1075_v43, %v1061_v35  ;;  %v1039_v51 = vadd.f32 (!%p1296_p10), %v1038_v42, %v944_v27 }
 0x21e   : > { %v947_v36 = vld [vmem:[#allocation2 + $0x38] sm:$0xff] (!%p1296_p10) }
 0x21f   : > { %929 = vst [vmem:[#allocation2 + $0x48] sm:$0xff] %v913_v52  ;;  %v1426_v53 = vpop.f32.mrb[20].mxu1  ;;  %v1351_v39 = vpack.c.bf16 (!%p1296_p10), %v947_v36, %v946_v32  ;;  %v1063_v52 = vmul.f32 (!%p1296_p10), %v945_v28, %v945_v28 }
 0x220   : > { %v1427_v55 = vpop.f32.mrb[21].mxu1 }
 0x221   : > { %v1428_v56 = vadd.f32 %v1427_v55, %v1426_v53  ;;  %v1429_v57 = vpop.f32.mrb[22].mxu1  ;;  %1375 = vst [vmem:[%s1687_s18 + $0x18] sm:$0xff] (!%p1296_p10), %v1351_v39  }
 0x222   : > { %v1430_v59 = vpop.f32.mrb[23].mxu1 }
 0x223   : > { %v914_v60 = vadd.f32 %v1428_v56, %v689_v54  ;;  %v1431_v61 = vadd.f32 %v1430_v59, %v1429_v57  ;;  %v1040_v56 = vadd.f32 (!%p1296_p10), %v1039_v51, %v945_v28  ;;  %v1077_v57 = vadd.f32 (!%p1296_p10), %v1076_v50, %v1062_v44 }
 0x224   : > { %v948_v37 = vld [vmem:[#allocation2 + $0x40] sm:$0xff] (!%p1296_p10) }
 0x225   : > { %930 = vst [vmem:[#allocation2 + $0x50] sm:$0xff] %v914_v60  ;;  %v915_v62 = vadd.f32 %v1431_v61, %v690_v58  ;;  %v1064_v58 = vmul.f32 (!%p1296_p10), %v946_v32, %v946_v32  ;;  %v1078_v59 = vadd.f32 (!%p1296_p10), %v1077_v57, %v1063_v52  ;;  %v1041_v60 = vadd.f32 (!%p1296_p10), %v1040_v56, %v946_v32 }
 0x226   : > { %v949_v38 = vld [vmem:[#allocation2 + $0x48] sm:$0xff] (!%p1296_p10)  ;;  %v1065_v61 = vmul.f32 (!%p1296_p10), %v947_v36, %v947_v36 }
 0x227   : > { %931 = vst [vmem:[#allocation2 + $0x58] sm:$0xff] %v915_v62  ;;  %v1432_v63 = vpop.f32.mrb[24].mxu1  ;;  %v1356_v40 = vpack.c.bf16 (!%p1296_p10), %v949_v38, %v948_v37  ;;  %v1042_v62 = vadd.f32 (!%p1296_p10), %v1041_v60, %v947_v36 }
 0x228   : > { %v1433_v1 = vpop.f32.mrb[25].mxu1 }
 0x229   : > { %v1434_v2 = vadd.f32 %v1433_v1, %v1432_v63  ;;  %v1435_v3 = vpop.f32.mrb[26].mxu1  ;;  %1376 = vst [vmem:[%s1687_s18 + $0x20] sm:$0xff] (!%p1296_p10), %v1356_v40   ;;  %v1079_v63 = vadd.f32 (!%p1296_p10), %v1078_v59, %v1064_v58 }
 0x22a   : > { %v1436_v5 = vpop.f32.mrb[27].mxu1 }
 0x22b   : > { %v916_v6 = vadd.f32 %v1434_v2, %v691_v0  ;;  %v1437_v7 = vadd.f32 %v1436_v5, %v1435_v3  ;;  %v1066_v0 = vmul.f32 (!%p1296_p10), %v948_v37, %v948_v37  ;;  %v1080_v1 = vadd.f32 (!%p1296_p10), %v1079_v63, %v1065_v61 }
 0x22c   : > { %v950_v41 = vld [vmem:[#allocation2 + $0x50] sm:$0xff] (!%p1296_p10)  ;;  %v1043_v2 = vadd.f32 (!%p1296_p10), %v1042_v62, %v948_v37  ;;  %v1067_v3 = vmul.f32 (!%p1296_p10), %v949_v38, %v949_v38 }
 0x22d   : > { %932 = vst [vmem:[#allocation2 + $0x60] sm:$0xff] %v916_v6  ;;  %v917_v8 = vadd.f32 %v1437_v7, %v692_v4  ;;  %v1081_v5 = vadd.f32 (!%p1296_p10), %v1080_v1, %v1066_v0  ;;  %v1068_v6 = vmul.f32 (!%p1296_p10), %v950_v41, %v950_v41 }
 0x22e   : > { %v951_v45 = vld [vmem:[#allocation2 + $0x58] sm:$0xff] (!%p1296_p10)  ;;  %v1044_v4 = vadd.f32 (!%p1296_p10), %v1043_v2, %v949_v38 }
 0x22f   : > { %933 = vst [vmem:[#allocation2 + $0x68] sm:$0xff] %v917_v8  ;;  %v1438_v9 = vpop.f32.mrb[28].mxu1  ;;  %v1361_v48 = vpack.c.bf16 (!%p1296_p10), %v951_v45, %v950_v41  ;;  %v1082_v7 = vadd.f32 (!%p1296_p10), %v1081_v5, %v1067_v3 }
 0x230   : > { %v1439_v10 = vpop.f32.mrb[29].mxu1  ;;  %v1045_v8 = vadd.f32 (!%p1296_p10), %v1044_v4, %v950_v41 }
 0x231   : > { %v1440_v11 = vadd.f32 %v1439_v10, %v1438_v9  ;;  %v1441_v16 = vpop.f32.mrb[30].mxu1  ;;  %939 = sbr.rel (%p1296_p10) target bundleno = 592 (0x250), region = 48  ;;  %1377 = vst [vmem:[%s1687_s18 + $0x28] sm:$0xff] (!%p1296_p10), %v1361_v48   ;;  %v1069_v9 = vmul.f32 (!%p1296_p10), %v951_v45, %v951_v45  ;;  %v1083_v10 = vadd.f32 (!%p1296_p10), %v1082_v7, %v1068_v6 }
 0x232   : > { %v1442_v13 = vpop.f32.mrb[31].mxu1 }
 0x233   : > { %v918_v14 = vadd.f32 %v1440_v11, %v693_v15  ;;  %v1443_v17 = vadd.f32 %v1442_v13, %v1441_v16  ;;  %v1046_v15 = vadd.f32 (!%p1296_p10), %v1045_v8, %v951_v45  ;;  %v1084_v16 = vadd.f32 (!%p1296_p10), %v1083_v10, %v1069_v9 }
 0x234   : > { %v952_v46 = vld [vmem:[#allocation2 + $0x60] sm:$0xff] (!%p1296_p10) }
 0x235   : > { %934 = vst [vmem:[#allocation2 + $0x70] sm:$0xff] %v918_v14  ;;  %v919_v18 = vadd.f32 %v1443_v17, %v694_v12  ;;  %v1070_v11 = vmul.f32 (!%p1296_p10), %v952_v46, %v952_v46  ;;  %v1047_v12 = vadd.f32 (!%p1296_p10), %v1046_v15, %v952_v46 }
 0x236   : > { %v953_v47 = vld [vmem:[#allocation2 + $0x68] sm:$0xff] (!%p1296_p10) }
 0x237   : > { %935 = vst [vmem:[#allocation2 + $0x78] sm:$0xff] %v919_v18  ;;  %v1366_v49 = vpack.c.bf16 (!%p1296_p10), %v953_v47, %v952_v46  ;;  %v1071_v13 = vmul.f32 (!%p1296_p10), %v953_v47, %v953_v47  ;;  %v1048_v14 = vadd.f32 (!%p1296_p10), %v1047_v12, %v953_v47  ;;  %v1085_v17 = vadd.f32 (!%p1296_p10), %v1084_v16, %v1070_v11 }
 0x239   : > { %1378 = vst [vmem:[%s1687_s18 + $0x30] sm:$0xff] %v1366_v49   ;;  %v1086_v19 = vadd.f32 %v1085_v17, %v1071_v13 }
 0x23c   : > { %v954_v53 = vld [vmem:[#allocation2 + $0x70] sm:$0xff] }
 0x23d   : > { %v1072_v18 = vmul.f32 %v954_v53, %v954_v53  ;;  %v1049_v20 = vadd.f32 %v1048_v14, %v954_v53 }
 0x23e   : > { %v955_v54 = vld [vmem:[#allocation2 + $0x78] sm:$0xff] }
 0x23f   : > { %v1371_v55 = vpack.c.bf16 %v955_v54, %v954_v53  ;;  %v1073_v21 = vmul.f32 %v955_v54, %v955_v54  ;;  %v1050_v22 = vadd.f32 %v1049_v20, %v955_v54  ;;  %v1087_v23 = vadd.f32 %v1086_v19, %v1072_v18 }
 0x241   : > { %1379 = vst [vmem:[%s1687_s18 + $0x38] sm:$0xff] %v1371_v55   ;;  %v1051_v24 = vrot.slane %v1050_v22, 4  ;;  %v1088_v25 = vadd.f32 %v1087_v23, %v1073_v21 }
 0x243   : > { %v1052_v26 = vadd.f32 %v1051_v24, %v1050_v22  ;;  %v1089_v27 = vrot.slane %v1088_v25, 4 }
 0x245   : > { %v1053_v28 = vrot.slane %v1052_v26, 2  ;;  %v1090_v29 = vadd.f32 %v1089_v27, %v1088_v25 }
 0x247   : > { %v1054_v30 = vadd.f32 %v1053_v28, %v1052_v26  ;;  %v1091_v31 = vrot.slane %v1090_v29, 2 }
 0x249   : > { %v1055_v32 = vrot.slane %v1054_v30, 1  ;;  %v1092_v33 = vadd.f32 %v1091_v31, %v1090_v29 }
 0x24b   : > { %v1056_v34 = vadd.f32 %v1055_v32, %v1054_v30  ;;  %v1093_v35 = vrot.slane %v1092_v33, 1 }
 0x24d   : > { %1057 = vst [vmem:[%s1717_s8] sm:$0x1] %v1056_v34  ;;  %v1094_v36 = vadd.f32 %v1093_v35, %v1092_v33 }
 0x24f   : > { %1095 = vst [vmem:[%s1717_s8 + $0x1] sm:$0x1] %v1094_v36 }
 0x250 PF: > { %s17_s27 = sadd.s32 1, %s1595_s27   ;;  %s1893_s21 = smov %s1583_s24 }
 0x251   : > { %p14_p11 = scmp.ge.s32.totalorder %s17_s27, 10   ;;  %s1894_s22 = smov %s1587_s25 }
 0x252   : > { %s1895_s23 = smov %s1591_s26  ;;  %s1896_s24 = smov %s1900_s28 }
 0x253   : > { %s1897_s25 = smov %s1904_s29  ;;  %s1898_s26 = smov %s1908_s30 }
 0x254   :  { %16 = sbr.rel (!%p14_p11) target bundleno = 4 (0x4), region = 93 }

</bundles_post_ra>
